<compile_context>
chip_gen: v7x
topology: tpu7x:2x2x1
jax: 0.10.0
libtpu: 0.0.40
codegen_flags: <defaults>
</compile_context>

<pallas_src>
import jax
import jax.numpy as jnp
from jax.experimental import pallas as pl
from jax.experimental.pallas import tpu as pltpu


# Lane-chunk width for the fused fc3 / fc_final-A dot: keeps only a
# (256+out_ch, _LANE_CHUNK) f32 slice live instead of the full (256, N) g slab.
_LANE_CHUNK = 2048


def uv_pointnet_kernel(x_ref, w1_ref, b1_ref, w2_ref, b2_ref, wsk_ref,
                       wfb_ref, b3_ref, bf_ref, o_ref, outa_ref):
    """One batch element per grid step.

    x_ref   : (C, N)            input dtype (channels on sublanes, points on lanes)
    w1_ref  : (64, C)      bf16     b1_ref : (64, 1)      f32
    w2_ref  : (128, 64)    bf16     b2_ref : (128, 1)     f32
    wsk_ref : (256+out_ch, 128) bf16  == stack([w3, wf[:, :128]])
    wfb_ref : (out_ch, 256) f32       == wf[:, 128:]
    b3_ref  : (256, 1)     f32       bf_ref : (out_ch, 1) f32
    o_ref   : (out_ch, N)  output dtype
    outa_ref: (out_ch, N)  f32 VMEM scratch (fc_final x_flat part, pre global term)
    """
    n = x_ref.shape[-1]

    # fc1 + ReLU -> (64, N).  bf16 operands on the MXU, f32 accumulation.
    x2 = x_ref[...].astype(jnp.bfloat16)
    h1 = jnp.dot(w1_ref[...], x2, preferred_element_type=jnp.float32) + b1_ref[...]
    h1 = jnp.maximum(h1, 0.0).astype(jnp.bfloat16)

    # fc2 + ReLU -> (128, N)  (x_flat in the torch code); stays VMEM resident.
    h2 = jnp.dot(w2_ref[...], h1, preferred_element_type=jnp.float32) + b2_ref[...]
    h2 = jnp.maximum(h2, 0.0).astype(jnp.bfloat16)

    # Fused fc3 + fc_final[:, :128]: one (256+out_ch, 128)@(128, chunk) dot per
    # lane chunk.  Only a chunk of g is ever live (running max); b3 folded in
    # after the max.
    lc = min(n, _LANE_CHUNK)
    gmax = jnp.full((256, 1), -jnp.inf, dtype=jnp.float32)
    for start in range(0, n, lc):
        stop = min(start + lc, n)
        s = jnp.dot(wsk_ref[...], h2[:, start:stop],
                    preferred_element_type=jnp.float32)        # (256+out_ch, chunk)
        gmax = jnp.maximum(gmax, jnp.max(s[:256], axis=1, keepdims=True))
        outa_ref[:, start:stop] = s[256:]

    # Global-feature part of fc_final: single tiny (out_ch, 256)@(256, 1) dot.
    gterm = jnp.dot(wfb_ref[...], gmax + b3_ref[...],
                    preferred_element_type=jnp.float32)        # (out_ch, 1)

    # Lane-dense single store of the whole output block.
    o_ref[...] = (outa_ref[...] + gterm + bf_ref[...]).astype(o_ref.dtype)


def init_params(key, in_ch, out_ch, dtype=jnp.float32):
    """Deterministic synthetic parameters matching nn.Conv1d(.., .., 1) shapes."""
    ks = jax.random.split(key, 8)
    # nn.Conv1d weight (Cout, Cin, 1) stored squeezed as (Cout, Cin);
    # bias (Cout,) stored as (Cout, 1) for lane-broadcast adds.
    w1 = (jax.random.normal(ks[0], (64, in_ch)) * 0.1).astype(dtype)
    b1 = (jax.random.normal(ks[1], (64, 1)) * 0.1).astype(dtype)
    w2 = (jax.random.normal(ks[2], (128, 64)) * 0.1).astype(dtype)
    b2 = (jax.random.normal(ks[3], (128, 1)) * 0.1).astype(dtype)
    w3 = (jax.random.normal(ks[4], (256, 128)) * 0.1).astype(dtype)
    b3 = (jax.random.normal(ks[5], (256, 1)) * 0.1).astype(dtype)
    # fc_final weight (out_ch, 128 + 256, 1): first 128 input channels act on
    # x_flat (h2), last 256 act on the repeated global-max feature.
    wf = (jax.random.normal(ks[6], (out_ch, 128 + 256)) * 0.1).astype(dtype)
    bf = (jax.random.normal(ks[7], (out_ch, 1)) * 0.1).astype(dtype)
    return (w1, b1, w2, b2, w3, b3, wf, bf)


def uv_pointnet(x_nchw, params):
    w1, b1, w2, b2, w3, b3, wf, bf = params
    b, c, h, w = x_nchw.shape
    n = h * w
    out_ch = wf.shape[0]

    # NCHW -> (B, C, N): free reshape, no host transpose needed because the
    # kernel works channels-as-rows / points-on-lanes.
    x_bcn = x_nchw.reshape(b, c, n)

    # bf16 weights at the MXU boundary (f32 accumulation in kernel).  fc3 and
    # the x_flat half of fc_final share the same h2 operand with K=128, so they
    # are stacked into one weight; the global-feature half (1-lane dot) and the
    # biases stay f32.
    w1b = w1.astype(jnp.bfloat16)
    w2b = w2.astype(jnp.bfloat16)
    wskb = jnp.concatenate([w3, wf[:, :128]], axis=0).astype(jnp.bfloat16)
    wfb = wf[:, 128:]

    def const_spec(shape):
        nd = len(shape)
        return pl.BlockSpec(shape, lambda i, _nd=nd: (0,) * _nd)

    # VMEM budget per grid step (double-buffered x/out blocks, resident bf16
    # h1/h2, outa scratch, one fused chunk result, weights + slack).  Raise the
    # scoped limit with headroom, but stay below v7x's 64 MiB physical VMEM.
    lc = min(n, _LANE_CHUNK)
    itemsize = x_nchw.dtype.itemsize
    per_step = (2 * c * n * itemsize
                + 2 * out_ch * n * itemsize
                + (64 + 128) * n * 2
                + out_ch * n * 4
                + (256 + out_ch) * lc * 4
                + 2 * 1024 * 1024)
    vmem_limit = int(min(max(2 * per_step, 32 * 1024 * 1024), 56 * 1024 * 1024))

    out_bcn = pl.pallas_call(
        uv_pointnet_kernel,
        out_shape=jax.ShapeDtypeStruct((b, out_ch, n), x_nchw.dtype),
        grid_spec=pltpu.PrefetchScalarGridSpec(
            num_scalar_prefetch=0,
            grid=(b,),
            in_specs=[
                pl.BlockSpec((None, c, n), lambda i: (i, 0, 0)),
                const_spec(w1b.shape), const_spec(b1.shape),
                const_spec(w2b.shape), const_spec(b2.shape),
                const_spec(wskb.shape), const_spec(wfb.shape),
                const_spec(b3.shape), const_spec(bf.shape),
            ],
            out_specs=pl.BlockSpec((None, out_ch, n), lambda i: (i, 0, 0)),
            scratch_shapes=[pltpu.VMEM((out_ch, n), jnp.float32)],
        ),
        compiler_params=pltpu.CompilerParams(
            dimension_semantics=("parallel",),
            vmem_limit_bytes=vmem_limit),
    )(x_bcn, w1b, b1, w2b, b2, wskb, wfb, b3, bf)

    # (B, out_ch, N) -> (B, out_ch, H, W): free reshape (matches torch .view).
    return out_bcn.reshape(b, out_ch, h, w)


def uv_pointnet_ref(x_nchw, params):
    """Pure-JAX f32 reference mirroring the PyTorch forward exactly."""
    w1, b1, w2, b2, w3, b3, wf, bf = params
    b, c, h, w = x_nchw.shape
    n = h * w
    xf = x_nchw.reshape(b, c, n).astype(jnp.float32)
    h1 = jax.nn.relu(jnp.einsum('oc,bcn->bon', w1, xf) + b1[None])
    h2 = jax.nn.relu(jnp.einsum('oc,bcn->bon', w2, h1) + b2[None])
    g = jnp.einsum('oc,bcn->bon', w3, h2) + b3[None]
    gmax = jnp.max(g, axis=-1, keepdims=True)                       # (B, 256, 1)
    feat = jnp.concatenate([h2, jnp.broadcast_to(gmax, (b, 256, n))], axis=1)
    out = jnp.einsum('oc,bcn->bon', wf, feat) + bf[None]
    return out.reshape(b, -1, h, w).astype(x_nchw.dtype)


if __name__ == "__main__":
    key = jax.random.PRNGKey(0)
    k_x, k_p = jax.random.split(key)

    B, IN_CH, H, W = 2, 4, 16, 16
    OUT_CH = 8

    x = jax.random.normal(k_x, (B, IN_CH, H, W), dtype=jnp.float32)
    params = init_params(k_p, IN_CH, OUT_CH, dtype=jnp.float32)

    out = jax.block_until_ready(uv_pointnet(x, params))
    ref = uv_pointnet_ref(x, params)

    assert out.shape == (B, OUT_CH, H, W), out.shape
    err = float(jnp.max(jnp.abs(out.astype(jnp.float32) - ref.astype(jnp.float32))))
    scale = float(jnp.max(jnp.abs(ref)))
    assert err <= 5e-2 * scale + 5e-3, (err, scale)

    print("KERNEL_OK")
</pallas_src>

<mosaic_0001>
module attributes {stable_mosaic.version = 11 : i64} {
  func.func @uv_pointnet_kernel(%arg0: i32, %arg1: memref<1x4x256xf32, #tpu.memory_space<vmem>>, %arg2: memref<64x4xbf16, #tpu.memory_space<vmem>>, %arg3: memref<64x1xf32, #tpu.memory_space<vmem>>, %arg4: memref<128x64xbf16, #tpu.memory_space<vmem>>, %arg5: memref<128x1xf32, #tpu.memory_space<vmem>>, %arg6: memref<264x128xbf16, #tpu.memory_space<vmem>>, %arg7: memref<8x256xf32, #tpu.memory_space<vmem>>, %arg8: memref<256x1xf32, #tpu.memory_space<vmem>>, %arg9: memref<8x1xf32, #tpu.memory_space<vmem>>, %arg10: memref<1x8x256xf32, #tpu.memory_space<vmem>>, %arg11: memref<8x256xf32, #tpu.memory_space<vmem>>) attributes {dimension_semantics = [#tpu.dimension_semantics<parallel>], iteration_bounds = array<i64: 2>, scalar_prefetch = 0 : i64, scratch_operands = 1 : i64, tpu.core_type = #tpu.core_type<tc>, window_params = [{transform_indices = @transform_0, window_bounds = array<i64: 1, 4, 256>}, {pipeline_mode = #tpu.pipeline_mode<synchronous>, transform_indices = @transform_1, window_bounds = array<i64: 64, 4>}, {pipeline_mode = #tpu.pipeline_mode<synchronous>, transform_indices = @transform_2, window_bounds = array<i64: 64, 1>}, {pipeline_mode = #tpu.pipeline_mode<synchronous>, transform_indices = @transform_3, window_bounds = array<i64: 128, 64>}, {pipeline_mode = #tpu.pipeline_mode<synchronous>, transform_indices = @transform_4, window_bounds = array<i64: 128, 1>}, {pipeline_mode = #tpu.pipeline_mode<synchronous>, transform_indices = @transform_5, window_bounds = array<i64: 264, 128>}, {pipeline_mode = #tpu.pipeline_mode<synchronous>, transform_indices = @transform_6, window_bounds = array<i64: 8, 256>}, {pipeline_mode = #tpu.pipeline_mode<synchronous>, transform_indices = @transform_7, window_bounds = array<i64: 256, 1>}, {pipeline_mode = #tpu.pipeline_mode<synchronous>, transform_indices = @transform_8, window_bounds = array<i64: 8, 1>}, {transform_indices = @transform_9, window_bounds = array<i64: 1, 8, 256>}]} {
    %c0 = arith.constant 0 : index
    %c0_0 = arith.constant 0 : index
    %c0_1 = arith.constant 0 : index
    %0 = vector.load %arg1[%c0, %c0_0, %c0_1] : memref<1x4x256xf32, #tpu.memory_space<vmem>>, vector<1x4x256xf32>
    %1 = vector.shape_cast %0 : vector<1x4x256xf32> to vector<4x256xf32>
    %2 = arith.truncf %1 : vector<4x256xf32> to vector<4x256xbf16>
    %c0_2 = arith.constant 0 : index
    %c0_3 = arith.constant 0 : index
    %3 = vector.load %arg2[%c0_2, %c0_3] : memref<64x4xbf16, #tpu.memory_space<vmem>>, vector<64x4xbf16>
    %cst = arith.constant dense<0.000000e+00> : vector<64x256xf32>
    %4 = tpu.matmul %3, %2, %cst {dimension_numbers = #tpu.dot_dimension_numbers<[1], [0], [0], [1], [0, 0, 1, 1], [], []>} : vector<64x4xbf16>, vector<4x256xbf16>, vector<64x256xf32> -> vector<64x256xf32>
    %c0_4 = arith.constant 0 : index
    %c0_5 = arith.constant 0 : index
    %5 = vector.load %arg3[%c0_4, %c0_5] : memref<64x1xf32, #tpu.memory_space<vmem>>, vector<64x1xf32>
    %6 = vector.broadcast %5 : vector<64x1xf32> to vector<64x256xf32>
    %7 = arith.addf %4, %6 : vector<64x256xf32>
    %cst_6 = arith.constant 0.000000e+00 : f32
    %8 = vector.broadcast %cst_6 : f32 to vector<64x256xf32>
    %9 = arith.maximumf %7, %8 : vector<64x256xf32>
    %10 = arith.truncf %9 : vector<64x256xf32> to vector<64x256xbf16>
    %c0_7 = arith.constant 0 : index
    %c0_8 = arith.constant 0 : index
    %11 = vector.load %arg4[%c0_7, %c0_8] : memref<128x64xbf16, #tpu.memory_space<vmem>>, vector<128x64xbf16>
    %cst_9 = arith.constant dense<0.000000e+00> : vector<128x256xf32>
    %12 = tpu.matmul %11, %10, %cst_9 {dimension_numbers = #tpu.dot_dimension_numbers<[1], [0], [0], [1], [0, 0, 1, 1], [], []>} : vector<128x64xbf16>, vector<64x256xbf16>, vector<128x256xf32> -> vector<128x256xf32>
    %c0_10 = arith.constant 0 : index
    %c0_11 = arith.constant 0 : index
    %13 = vector.load %arg5[%c0_10, %c0_11] : memref<128x1xf32, #tpu.memory_space<vmem>>, vector<128x1xf32>
    %14 = vector.broadcast %13 : vector<128x1xf32> to vector<128x256xf32>
    %15 = arith.addf %12, %14 : vector<128x256xf32>
    %cst_12 = arith.constant 0.000000e+00 : f32
    %16 = vector.broadcast %cst_12 : f32 to vector<128x256xf32>
    %17 = arith.maximumf %15, %16 : vector<128x256xf32>
    %18 = arith.truncf %17 : vector<128x256xf32> to vector<128x256xbf16>
    %cst_13 = arith.constant 0xFF800000 : f32
    %19 = vector.broadcast %cst_13 : f32 to vector<256x1xf32>
    %c0_14 = arith.constant 0 : index
    %c0_15 = arith.constant 0 : index
    %20 = vector.load %arg6[%c0_14, %c0_15] : memref<264x128xbf16, #tpu.memory_space<vmem>>, vector<264x128xbf16>
    %cst_16 = arith.constant dense<0.000000e+00> : vector<264x256xf32>
    %21 = tpu.matmul %20, %18, %cst_16 {dimension_numbers = #tpu.dot_dimension_numbers<[1], [0], [0], [1], [0, 0, 1, 1], [], []>} : vector<264x128xbf16>, vector<128x256xbf16>, vector<264x256xf32> -> vector<264x256xf32>
    %22 = vector.extract_strided_slice %21 {offsets = [0, 0], sizes = [256, 256], strides = [1, 1]} : vector<264x256xf32> to vector<256x256xf32>
    %cst_17 = arith.constant dense<0xFF800000> : vector<256xf32>
    %23 = vector.multi_reduction <maximumf>, %22, %cst_17 [1] : vector<256x256xf32> to vector<256xf32>
    %24 = vector.shape_cast %23 : vector<256xf32> to vector<256x1xf32>
    %25 = arith.maximumf %19, %24 : vector<256x1xf32>
    %26 = vector.extract_strided_slice %21 {offsets = [256, 0], sizes = [8, 256], strides = [1, 1]} : vector<264x256xf32> to vector<8x256xf32>
    %c0_18 = arith.constant 0 : index
    %c0_19 = arith.constant 0 : index
    %27 = vector.load %arg11[%c0_18, %c0_19] : memref<8x256xf32, #tpu.memory_space<vmem>>, vector<8x256xf32>
    tpu.vector_store %arg11[%c0_18, %c0_19], %26 {strides = array<i32>} : memref<8x256xf32, #tpu.memory_space<vmem>>, vector<8x256xf32>,
    %c0_20 = arith.constant 0 : index
    %c0_21 = arith.constant 0 : index
    %28 = vector.load %arg7[%c0_20, %c0_21] : memref<8x256xf32, #tpu.memory_space<vmem>>, vector<8x256xf32>
    %c0_22 = arith.constant 0 : index
    %c0_23 = arith.constant 0 : index
    %29 = vector.load %arg8[%c0_22, %c0_23] : memref<256x1xf32, #tpu.memory_space<vmem>>, vector<256x1xf32>
    %30 = arith.addf %25, %29 : vector<256x1xf32>
    %cst_24 = arith.constant dense<0.000000e+00> : vector<8x1xf32>
    %31 = tpu.matmul %28, %30, %cst_24 {dimension_numbers = #tpu.dot_dimension_numbers<[1], [0], [0], [1], [0, 0, 1, 1], [], []>} : vector<8x256xf32>, vector<256x1xf32>, vector<8x1xf32> -> vector<8x1xf32>
    %c0_25 = arith.constant 0 : index
    %c0_26 = arith.constant 0 : index
    %32 = vector.load %arg11[%c0_25, %c0_26] : memref<8x256xf32, #tpu.memory_space<vmem>>, vector<8x256xf32>
    %33 = vector.broadcast %31 : vector<8x1xf32> to vector<8x256xf32>
    %34 = arith.addf %32, %33 : vector<8x256xf32>
    %c0_27 = arith.constant 0 : index
    %c0_28 = arith.constant 0 : index
    %35 = vector.load %arg9[%c0_27, %c0_28] : memref<8x1xf32, #tpu.memory_space<vmem>>, vector<8x1xf32>
    %36 = vector.broadcast %35 : vector<8x1xf32> to vector<8x256xf32>
    %37 = arith.addf %34, %36 : vector<8x256xf32>
    %c0_29 = arith.constant 0 : index
    %c0_30 = arith.constant 0 : index
    %c0_31 = arith.constant 0 : index
    %38 = vector.load %arg10[%c0_29, %c0_30, %c0_31] : memref<1x8x256xf32, #tpu.memory_space<vmem>>, vector<1x8x256xf32>
    %39 = vector.shape_cast %38 : vector<1x8x256xf32> to vector<8x256xf32>
    %40 = vector.shape_cast %37 : vector<8x256xf32> to vector<1x8x256xf32>
    tpu.vector_store %arg10[%c0_29, %c0_30, %c0_31], %40 {strides = array<i32>} : memref<1x8x256xf32, #tpu.memory_space<vmem>>, vector<1x8x256xf32>,
    return
  }
  func.func @transform_0(%arg0: i32) -> (i32, i32, i32) {
    %c0_i32 = arith.constant 0 : i32
    %c0_i32_0 = arith.constant 0 : i32
    %c0_i32_1 = arith.constant 0 : i32
    return %arg0, %c0_i32, %c0_i32_0 : i32, i32, i32
  }
  func.func @transform_1(%arg0: i32) -> (i32, i32) {
    %c0_i32 = arith.constant 0 : i32
    %c0_i32_0 = arith.constant 0 : i32
    %c0_i32_1 = arith.constant 0 : i32
    return %c0_i32, %c0_i32_0 : i32, i32
  }
  func.func @transform_2(%arg0: i32) -> (i32, i32) {
    %c0_i32 = arith.constant 0 : i32
    %c0_i32_0 = arith.constant 0 : i32
    %c0_i32_1 = arith.constant 0 : i32
    return %c0_i32, %c0_i32_0 : i32, i32
  }
  func.func @transform_3(%arg0: i32) -> (i32, i32) {
    %c0_i32 = arith.constant 0 : i32
    %c0_i32_0 = arith.constant 0 : i32
    %c0_i32_1 = arith.constant 0 : i32
    return %c0_i32, %c0_i32_0 : i32, i32
  }
  func.func @transform_4(%arg0: i32) -> (i32, i32) {
    %c0_i32 = arith.constant 0 : i32
    %c0_i32_0 = arith.constant 0 : i32
    %c0_i32_1 = arith.constant 0 : i32
    return %c0_i32, %c0_i32_0 : i32, i32
  }
  func.func @transform_5(%arg0: i32) -> (i32, i32) {
    %c0_i32 = arith.constant 0 : i32
    %c0_i32_0 = arith.constant 0 : i32
    %c0_i32_1 = arith.constant 0 : i32
    return %c0_i32, %c0_i32_0 : i32, i32
  }
  func.func @transform_6(%arg0: i32) -> (i32, i32) {
    %c0_i32 = arith.constant 0 : i32
    %c0_i32_0 = arith.constant 0 : i32
    %c0_i32_1 = arith.constant 0 : i32
    return %c0_i32, %c0_i32_0 : i32, i32
  }
  func.func @transform_7(%arg0: i32) -> (i32, i32) {
    %c0_i32 = arith.constant 0 : i32
    %c0_i32_0 = arith.constant 0 : i32
    %c0_i32_1 = arith.constant 0 : i32
    return %c0_i32, %c0_i32_0 : i32, i32
  }
  func.func @transform_8(%arg0: i32) -> (i32, i32) {
    %c0_i32 = arith.constant 0 : i32
    %c0_i32_0 = arith.constant 0 : i32
    %c0_i32_1 = arith.constant 0 : i32
    return %c0_i32, %c0_i32_0 : i32, i32
  }
  func.func @transform_9(%arg0: i32) -> (i32, i32, i32) {
    %c0_i32 = arith.constant 0 : i32
    %c0_i32_0 = arith.constant 0 : i32
    %c0_i32_1 = arith.constant 0 : i32
    return %arg0, %c0_i32, %c0_i32_0 : i32, i32, i32
  }
}

</mosaic_0001>

<bundles_post_ra>
// kernel: tpu_custom_call.1
= control target key start
LH: loop header
LB: loop body
LE: loop exit
PB: predicated region body
PF: predicated region fallthrough
CT: control target
= control target key end

     0   :  { %14 = vsyncpa [#allocation4], 0  ;;  %s2315_s0 = inlined_call_operand.vmem [shape: f32[2,4,256], index: 0, kind: input, shape index: {}]   ;;  %s2316_s1 = inlined_call_operand.vmem [shape: bf16[64,4], index: 1, kind: input, shape index: {}]   ;;  %s2317_s2 = inlined_call_operand.vmem [shape: f32[64,1], index: 2, kind: input, shape index: {}]   ;;  %s2318_s3 = inlined_call_operand.vmem [shape: bf16[128,64], index: 3, kind: input, shape index: {}]   ;;  %s2319_s4 = inlined_call_operand.vmem [shape: f32[128,1], index: 4, kind: input, shape index: {}]   ;;  %s2320_s5 = inlined_call_operand.vmem [shape: bf16[264,128], index: 5, kind: input, shape index: {}]   ;;  %s2321_s6 = inlined_call_operand.vmem [shape: f32[8,256], index: 6, kind: input, shape index: {}]   ;;  %s2322_s7 = inlined_call_operand.vmem [shape: f32[256,1], index: 7, kind: input, shape index: {}]   ;;  %s2323_s8 = inlined_call_operand.vmem [shape: f32[8,1], index: 8, kind: input, shape index: {}]   ;;  %s2324_s9 = inlined_call_operand.hbm [shape: f32[2,8,256], index: 9, kind: output, shape index: {}]  }
   0x1   :  { %16 = vsyncpa [#allocation4 + $0x1], 0  ;;  %s1857_s30 = smov 0   ;;  %s1859_s10 = smov 0  }
   0x2   :  { %s1861_s11 = smov 0   ;;  %s1863_s12 = smov 0  }
   0x3 LB: > { %s1878_s13 = sadd.s32 4294967295, %s1803_s12   ;;  %s1530_s14 = sadd.s32 4294967294, %s1803_s12   ;;  %s1803_s12 = sphi %s1863_s12, %s2330_s12   ;;  %s1799_s11 = sphi %s1861_s11, %s2329_s11   ;;  %s1795_s10 = sphi %s1859_s10, %s2328_s10   ;;  %s1791_s30 = sphi %s1857_s30, %s2327_s30  }
   0x4   : > { %s1882_s15 = sadd.s32 1, %s1803_s12   ;;  %s223_s16 = sadd.s32 1, %s1799_s11 }
   0x5   : > { %s220_s17 = ssub.s32 %s1803_s12, %s1882_s15  ;;  %p233_p0 = scmp.ne.s32.totalorder %s1799_s11, %s1795_s10 }
   0x6   : > { %p221_p1 = scmp.eq.s32.totalorder %s220_s17, 0  ;;  %p234_p2 = scmp.eq.s32.totalorder %s1878_s13, 1 }
   0x7   : > { %p239_p3 = scmp.ne.s32.totalorder %s1795_s10, %s1791_s30  ;;  %p240_p4 = scmp.eq.s32.totalorder %s1530_s14, 1 }
   0x8   : > { %s1893_s18 = scalar_select %p221_p1, %s1799_s11, %s223_s16  }
   0x9   : > { %p1895_p5 = por %p234_p2, %p233_p0  ;;  %p1899_p6 = por %p240_p4, %p239_p3 }
   0xa   : > { %p1533_p7 = scmp.ge.s32.totalorder %s1803_s12, 1  ;;  %p290_p8 = scmp.lt.s32.totalorder %s1803_s12, 3 }
   0xc   : > { %p291_p9 = pnand %p1533_p7, %p290_p8 }
   0xd   : > { %p326_p10 = scmp.lt.s32.totalorder (!%p291_p9), %s1878_s13, 1  ;;  %v1805_v0 = vmov (!%p291_p9), 0   ;;  %v346_v1 = vld [vmem:[%s2317_s2] sm:$0xff] (!%p291_p9)  ;;  %v348_v2 = vld [vmem:[%s2317_s2 + $0x10] sm:$0xff] (!%p291_p9)  ;;  %vm427_vm0 = vcmask (!%p291_p9), 1041408   ;;  %v347_v4 = vld [vmem:[%s2317_s2 + $0x8] sm:$0xff] (!%p291_p9) }
   0xe   : > { %294 = sbr.rel (%p291_p9) target bundleno = 1399 (0x577), region = 56  ;;  %466 = vmatprep.mubr.bf16.mxu0 (!%p291_p9), %v1805_v0  ;;  %1709 = vset.pattern.permute.xlu0 (!%p291_p9), %v1805_v0  ;;  %v349_v5 = vld [vmem:[%s2317_s2 + $0x18] sm:$0xff] (!%p291_p9)  ;;  %v350_v10 = vld [vmem:[%s2317_s2 + $0x20] sm:$0xff] (!%p291_p9)  ;;  %v351_v11 = vld [vmem:[%s2317_s2 + $0x28] sm:$0xff] (!%p291_p9)  ;;  %vm414_vm1 = vcmask (!%p291_p9), 31744   ;;  %vm683_vm2 = vcmask (!%p291_p9), 523264  }
   0xf   : > { %1710 = vset.pattern.permute.xlu1 (!%p291_p9), %v1805_v0  ;;  %740 = vmatprep.mubr.bf16.mxu1 (!%p291_p9), %v1805_v0  ;;  %v1712_v12 = vld [vmem:[%s2316_s1] sm:$0xff] (!%p291_p9)   ;;  %v352_v13 = vld [vmem:[%s2317_s2 + $0x30] sm:$0xff] (!%p291_p9)  ;;  %v353_v14 = vld [vmem:[%s2317_s2 + $0x38] sm:$0xff] (!%p291_p9)  ;;  %s323_s23 = sand.u32 (!%p291_p9), 1, %s1795_s10   ;;  %s1585_s24 = sshll.u32 (!%p291_p9), %s1878_s13, 8 }
  0x10   : > { %356 = vperm.xlu0 (!%p291_p9), %1709, %v346_v1   ;;  %366 = vperm.xlu1 (!%p291_p9), %1710, %v348_v2   ;;  %v547_v15 = vld [vmem:[%s2319_s4] sm:$0xff] (!%p291_p9)  ;;  %v548_v16 = vld [vmem:[%s2319_s4 + $0x8] sm:$0xff] (!%p291_p9)  ;;  %v549_v18 = vld [vmem:[%s2319_s4 + $0x10] sm:$0xff] (!%p291_p9)  ;;  %s1806_s16 = smov (!%p291_p9), [#allocation3]  }
  0x11   : > { %v1713_v17 = vld [vmem:[%s2316_s1 + $0x8] sm:$0xff] (!%p291_p9)   ;;  %v550_v19 = vld [vmem:[%s2319_s4 + $0x18] sm:$0xff] (!%p291_p9)  ;;  %v551_v20 = vld [vmem:[%s2319_s4 + $0x20] sm:$0xff] (!%p291_p9)  ;;  %s1745_s17 = sshll.u32 (!%p291_p9), %s1806_s16, 4  ;;  %s1746_s17 = int_to_ptr.vmem [resolvable:$false] %s1745_s17 }
  0x12   : > { %v552_v21 = vld [vmem:[%s2319_s4 + $0x28] sm:$0xff] (!%p291_p9)  ;;  %v1714_v22 = vld [vmem:[%s2316_s1 + $0x10] sm:$0xff] (!%p291_p9)   ;;  %v554_v24 = vld [vmem:[%s2319_s4 + $0x38] sm:$0xff] (!%p291_p9) }
  0x13   : > { %v553_v23 = vld [vmem:[%s2319_s4 + $0x30] sm:$0xff] (!%p291_p9)  ;;  %v555_v25 = vld [vmem:[%s2319_s4 + $0x40] sm:$0xff] (!%p291_p9)  ;;  %v556_v26 = vld [vmem:[%s2319_s4 + $0x48] sm:$0xff] (!%p291_p9) }
  0x14   : > { %361 = vperm.xlu0 (!%p291_p9), %1709, %v347_v4   ;;  %371 = vperm.xlu1 (!%p291_p9), %1710, %v349_v5   ;;  %v1715_v27 = vld [vmem:[%s2316_s1 + $0x18] sm:$0xff] (!%p291_p9)   ;;  %v557_v28 = vld [vmem:[%s2319_s4 + $0x50] sm:$0xff] (!%p291_p9)  ;;  %v559_v30 = vld [vmem:[%s2319_s4 + $0x60] sm:$0xff] (!%p291_p9) }
  0x15   : > { %s327_s21 = scalar_select %p326_p10, %s1878_s13, 1  ;;  %v558_v29 = vld [vmem:[%s2319_s4 + $0x58] sm:$0xff]  ;;  %v560_v31 = vld [vmem:[%s2319_s4 + $0x68] sm:$0xff]  ;;  %v561_v32 = vld [vmem:[%s2319_s4 + $0x70] sm:$0xff] }
  0x16   : > { %v562_v33 = vld [vmem:[%s2319_s4 + $0x78] sm:$0xff]  ;;  %s1457_s13 = scalar_lea.sflag [#allocation4], %s323_s23 }
  0x17   : > { %s1584_s22 = sshll.u32 %s327_s21, 3  ;;  %s1747_s21 = scalar_lea.vmem %s1746_s17, 512 }
  0x18   : > { %s330_s29 = scalar_lea.vmem %s2315_s0, %s1584_s22  ;;  %376 = vperm.xlu0 %1709, %v350_v10   ;;  %381 = vperm.xlu1 %1710, %v351_v11   ;;  %s1534_s22 = sshll.u32 %s323_s23, 4 }
  0x19   : > { %v332_v3 = vld [vmem:[%s330_s29] sm:$0xff]  ;;  %s325_s25 = scalar_lea.vmem [#allocation3], %s1534_s22  ;;  %s2273_s29 = scalar_lea.hbm %s2324_s9, %s1585_s24 }
  0x1a   : > { %v334_v6 = vcombine.high %v332_v3, %v332_v3  ;;  %v336_v7 = vpack.c.bf16 %v332_v3, %v332_v3  ;;  %s1471_s26 = sshll.u32 %s325_s25, 4  ;;  %s2275_s26 = int_to_ptr.vmem [resolvable:$true] %s1471_s26 }
  0x1b   : > { %s1741_s14 = scalar_lea.vmem %s2275_s26, 256  ;;  %p1748_p0 = scmp.lt.s32.totalorder %s2275_s26, %s1746_s17 }
  0x1c   : > { %v337_v8 = vpack.c.bf16 %v334_v6, %v334_v6  ;;  %v429_v9 = vsel %vm427_vm0, %v336_v7, 0  ;;  %386 = vperm.xlu0 %1709, %v352_v13   ;;  %391 = vperm.xlu1 %1710, %v353_v14   ;;  %p1742_p11 = scmp.ne.s32.totalorder %s2275_s26, %s1741_s14  ;;  %p1749_p1 = scmp.lt.s32.totalorder %s1747_s21, %s1741_s14 }
  0x1e   : > { %1541 = vmatprep.subr.msk.bf16.mxu0 %vm427_vm0, %v337_v8  ;;  %p1743_p12 = pnand %p1742_p11, %p1895_p5  ;;  %p1750_p2 = por %p1749_p1, %p1748_p0 }
  0x1f   : > { %435 = vmatpush1.bf16.msra.mxu0 %v429_v9 }
  0x20   : > { %565 = vperm.xlu0 %1709, %v547_v15   ;;  %570 = vperm.xlu1 %1710, %v548_v16   ;;  %p1744_p13 = pneg %p1743_p12 }
  0x22   : > { %1542 = vmatmul.mubr.msk.bf16.vlgmr.msra.gmra.mrb[0].mxu0 %vm414_vm1, %v1712_v12  ;;  %p1751_p3 = pnand %p1750_p2, %p1744_p13 }
  0x23   : > { %476 = vmatprep.mubr.bf16.mxu0 %v1805_v0 }
  0x24   : > { %575 = vperm.xlu0 %1709, %v549_v18   ;;  %580 = vperm.xlu1 %1710, %v550_v19  }
  0x28   : > { %585 = vperm.xlu0 %1709, %v551_v20   ;;  %590 = vperm.xlu1 %1710, %v552_v21  }
  0x2a   : > { %1543 = vmatmul.mubr.msk.bf16.gmra.mrb[4].mxu0 %vm414_vm1, %v1713_v17 }
  0x2b   : > { %486 = vmatprep.mubr.bf16.mxu0 %v1805_v0 }
  0x2c   : > { %595 = vperm.xlu0 %1709, %v553_v23   ;;  %600 = vperm.xlu1 %1710, %v554_v24  }
  0x30   : > { %605 = vperm.xlu0 %1709, %v555_v25   ;;  %610 = vperm.xlu1 %1710, %v556_v26  }
  0x32   : > { %1544 = vmatmul.mubr.msk.bf16.gmra.mrb[8].mxu0 %vm414_vm1, %v1714_v22 }
  0x33   : > { %496 = vmatprep.mubr.bf16.mxu0 %v1805_v0 }
  0x34   : > { %615 = vperm.xlu0 %1709, %v557_v28   ;;  %620 = vperm.xlu1 %1710, %v558_v29  }
  0x38   : > { %625 = vperm.xlu0 %1709, %v559_v30   ;;  %630 = vperm.xlu1 %1710, %v560_v31  }
  0x3a   : > { %1545 = vmatmul.mubr.msk.bf16.gmra.mrb[12].mxu0 %vm414_vm1, %v1715_v27 }
  0x3b   : > { %1034 = vmatprep.mubr.bf16.mxu0 %v1805_v0 }
  0x3c   : > { %635 = vperm.xlu0 %1709, %v561_v32   ;;  %640 = vperm.xlu1 %1710, %v562_v33  }
  0x8f   : > { %v357_v34 = vpop.permute.xlu0 %356  ;;  %v367_v43 = vpop.permute.xlu1 %366 }
  0x93   : > { %v362_v38 = vpop.permute.xlu0 %361  ;;  %v372_v54 = vpop.permute.xlu1 %371 }
  0x97   : > { %v377_v2 = vpop.permute.xlu0 %376  ;;  %v382_v7 = vpop.permute.xlu1 %381 }
  0x9b   : > { %v387_v18 = vpop.permute.xlu0 %386  ;;  %v392_v23 = vpop.permute.xlu1 %391 }
  0xf5   : > { %v468_v35 = vpop.f32.mrb[0].mxu0 }
  0xf6   : > { %v469_v36 = vadd.f32 %v468_v35, %v357_v34  ;;  %v470_v37 = vpop.f32.mrb[1].mxu0  ;;  %v1716_v35 = vld [vmem:[%s2318_s3] sm:$0xff]  }
  0xf7   : > { %v471_v39 = vadd.f32 %v470_v37, %v357_v34  ;;  %v472_v40 = vpop.f32.mrb[2].mxu0  ;;  %v1718_v37 = vld [vmem:[%s2318_s3 + $0x10] sm:$0xff]  }
  0xf8   : > { %v473_v41 = vadd.f32 %v472_v40, %v362_v38  ;;  %v474_v42 = vpop.f32.mrb[3].mxu0  ;;  %v507_v45 = vmax.f32 %v469_v36, 0.0  ;;  %v1717_v36 = vld [vmem:[%s2318_s3 + $0x8] sm:$0xff]  }
  0xf9   : > { %v475_v44 = vadd.f32 %v474_v42, %v362_v38  ;;  %v508_v47 = vmax.f32 %v471_v39, 0.0  ;;  %v1719_v38 = vld [vmem:[%s2318_s3 + $0x18] sm:$0xff]   ;;  %v1720_v39 = vld [vmem:[%s2318_s3 + $0x20] sm:$0xff]   ;;  %v1721_v40 = vld [vmem:[%s2318_s3 + $0x28] sm:$0xff]  }
  0xfa   : > { %v509_v46 = vmax.f32 %v473_v41, 0.0  ;;  %v1722_v41 = vld [vmem:[%s2318_s3 + $0x30] sm:$0xff]   ;;  %v1723_v42 = vld [vmem:[%s2318_s3 + $0x38] sm:$0xff]  }
  0xfb   : > { %v510_v48 = vmax.f32 %v475_v44, 0.0 }
  0xfc   : > { %v523_v49 = vpack.c.bf16 %v509_v46, %v507_v45 }
  0xfd   : > { %v478_v50 = vpop.f32.mrb[4].mxu0  ;;  %v524_v51 = vpack.c.bf16 %v510_v48, %v508_v47  ;;  %v571_v47 = vpop.permute.xlu1 %570 }
  0xfe   : > { %v479_v52 = vadd.f32 %v478_v50, %v367_v43  ;;  %v480_v53 = vpop.f32.mrb[5].mxu0 }
  0xff   : > { %v481_v55 = vadd.f32 %v480_v53, %v367_v43  ;;  %v482_v56 = vpop.f32.mrb[6].mxu0  ;;  %708 = vmatprep.subr.bf16.mxu1 %v524_v51  ;;  %v566_v43 = vpop.permute.xlu0 %565 }
 0x100   : > { %v483_v57 = vadd.f32 %v482_v56, %v372_v54  ;;  %v484_v58 = vpop.f32.mrb[7].mxu0  ;;  %709 = vmatpush1.bf16.msra.mxu1 %v523_v49  ;;  %v511_v60 = vmax.f32 %v479_v52, 0.0 }
 0x101   : > { %v485_v59 = vadd.f32 %v484_v58, %v372_v54  ;;  %v512_v62 = vmax.f32 %v481_v55, 0.0 }
 0x102   : > { %v513_v61 = vmax.f32 %v483_v57, 0.0 }
 0x103   : > { %v514_v63 = vmax.f32 %v485_v59, 0.0  ;;  %v576_v58 = vpop.permute.xlu0 %575 }
 0x104   : > { %v525_v1 = vpack.c.bf16 %v513_v61, %v511_v60 }
 0x105   : > { %v526_v3 = vpack.c.bf16 %v514_v63, %v512_v62  ;;  %v488_v4 = vpop.f32.mrb[8].mxu0  ;;  %v581_v63 = vpop.permute.xlu1 %580 }
 0x106   : > { %v489_v5 = vadd.f32 %v488_v4, %v377_v2  ;;  %v490_v6 = vpop.f32.mrb[9].mxu0 }
 0x107   : > { %v491_v8 = vadd.f32 %v490_v6, %v377_v2  ;;  %v492_v9 = vpop.f32.mrb[10].mxu0  ;;  %710 = vmatprep.subr.bf16.mxu1 %v526_v3 }
 0x108   : > { %v493_v10 = vadd.f32 %v492_v9, %v382_v7  ;;  %v494_v11 = vpop.f32.mrb[11].mxu0  ;;  %711 = vmatpush1.bf16.msra.mxu1 %v525_v1  ;;  %v515_v13 = vmax.f32 %v489_v5, 0.0 }
 0x109   : > { %v495_v12 = vadd.f32 %v494_v11, %v382_v7  ;;  %v516_v15 = vmax.f32 %v491_v8, 0.0  ;;  %v586_v11 = vpop.permute.xlu0 %585 }
 0x10a   : > { %v517_v14 = vmax.f32 %v493_v10, 0.0 }
 0x10b   : > { %v518_v16 = vmax.f32 %v495_v12, 0.0 }
 0x10c   : > { %v527_v17 = vpack.c.bf16 %v517_v14, %v515_v13 }
 0x10d   : > { %v528_v19 = vpack.c.bf16 %v518_v16, %v516_v15  ;;  %v498_v20 = vpop.f32.mrb[12].mxu0  ;;  %v591_v16 = vpop.permute.xlu1 %590 }
 0x10e   : > { %v499_v21 = vadd.f32 %v498_v20, %v387_v18  ;;  %v500_v22 = vpop.f32.mrb[13].mxu0 }
 0x10f   : > { %v501_v24 = vadd.f32 %v500_v22, %v387_v18  ;;  %v502_v25 = vpop.f32.mrb[14].mxu0  ;;  %712 = vmatprep.subr.bf16.mxu1 %v528_v19 }
 0x110   : > { %v503_v26 = vadd.f32 %v502_v25, %v392_v23  ;;  %v504_v27 = vpop.f32.mrb[15].mxu0  ;;  %713 = vmatpush1.bf16.msra.mxu1 %v527_v17  ;;  %v519_v29 = vmax.f32 %v499_v21, 0.0 }
 0x111   : > { %v505_v28 = vadd.f32 %v504_v27, %v392_v23  ;;  %v520_v31 = vmax.f32 %v501_v24, 0.0  ;;  %v596_v27 = vpop.permute.xlu0 %595 }
 0x112   : > { %v521_v30 = vmax.f32 %v503_v26, 0.0 }
 0x113   : > { %v522_v32 = vmax.f32 %v505_v28, 0.0 }
 0x114   : > { %v529_v33 = vpack.c.bf16 %v521_v30, %v519_v29 }
 0x115   : > { %v530_v34 = vpack.c.bf16 %v522_v32, %v520_v31  ;;  %v601_v32 = vpop.permute.xlu1 %600 }
 0x117   : > { %714 = vmatprep.subr.bf16.mxu1 %v530_v34 }
 0x118   : > { %715 = vmatpush1.bf16.msra.mxu1 %v529_v33 }
 0x11b   : > { %1554 = vmatmul.mubr.msk.bf16.vlgmr.msra.gmra.mrb[0].mxu1 %vm683_vm2, %v1716_v35 }
 0x11c   : > { %750 = vmatprep.mubr.bf16.mxu1 %v1805_v0 }
 0x123   : > { %1555 = vmatmul.mubr.msk.bf16.gmra.mrb[4].mxu1 %vm683_vm2, %v1717_v36 }
 0x124   : > { %760 = vmatprep.mubr.bf16.mxu1 %v1805_v0 }
 0x12b   : > { %1556 = vmatmul.mubr.msk.bf16.gmra.mrb[8].mxu1 %vm683_vm2, %v1718_v37 }
 0x12c   : > { %770 = vmatprep.mubr.bf16.mxu1 %v1805_v0 }
 0x133   : > { %1557 = vmatmul.mubr.msk.bf16.gmra.mrb[12].mxu1 %vm683_vm2, %v1719_v38 }
 0x134   : > { %780 = vmatprep.mubr.bf16.mxu1 %v1805_v0 }
 0x13b   : > { %1558 = vmatmul.mubr.msk.bf16.gmra.mrb[16].mxu1 %vm683_vm2, %v1720_v39 }
 0x13c   : > { %790 = vmatprep.mubr.bf16.mxu1 %v1805_v0 }
 0x143   : > { %1559 = vmatmul.mubr.msk.bf16.gmra.mrb[20].mxu1 %vm683_vm2, %v1721_v40 }
 0x144   : > { %800 = vmatprep.mubr.bf16.mxu1 %v1805_v0 }
 0x14b   : > { %1560 = vmatmul.mubr.msk.bf16.gmra.mrb[24].mxu1 %vm683_vm2, %v1722_v41 }
 0x14c   : > { %810 = vmatprep.mubr.bf16.mxu1 %v1805_v0 }
 0x153   : > { %1561 = vmatmul.mubr.msk.bf16.gmra.mrb[28].mxu1 %vm683_vm2, %v1723_v42 }
 0x154   : > { %1154 = vmatprep.mubr.bf16.mxu1 %v1805_v0 }
 0x1ee   : > { %v742_v44 = vpop.f32.mrb[0].mxu1 }
 0x1ef   : > { %v743_v45 = vadd.f32 %v742_v44, %v566_v43  ;;  %v744_v46 = vpop.f32.mrb[1].mxu1 }
 0x1f0   : > { %v745_v48 = vadd.f32 %v744_v46, %v566_v43  ;;  %v746_v49 = vpop.f32.mrb[2].mxu1  ;;  %v606_v43 = vpop.permute.xlu0 %605 }
 0x1f1   : > { %v747_v50 = vadd.f32 %v746_v49, %v571_v47  ;;  %v748_v51 = vpop.f32.mrb[3].mxu1  ;;  %v821_v53 = vmax.f32 %v743_v45, 0.0 }
 0x1f2   : > { %v749_v52 = vadd.f32 %v748_v51, %v571_v47  ;;  %v822_v55 = vmax.f32 %v745_v48, 0.0  ;;  %v611_v48 = vpop.permute.xlu1 %610 }
 0x1f3   : > { %v823_v54 = vmax.f32 %v747_v50, 0.0 }
 0x1f4   : > { %v824_v56 = vmax.f32 %v749_v52, 0.0 }
 0x1f5   : > { %v853_v57 = vpack.c.bf16 %v823_v54, %v821_v53 }
 0x1f6   : > { %v854_v59 = vpack.c.bf16 %v824_v56, %v822_v55  ;;  %v752_v60 = vpop.f32.mrb[4].mxu1 }
 0x1f7   : > { %v753_v61 = vadd.f32 %v752_v60, %v576_v58  ;;  %v754_v62 = vpop.f32.mrb[5].mxu1 }
 0x1f8   : > { %v755_v1 = vadd.f32 %v754_v62, %v576_v58  ;;  %v756_v2 = vpop.f32.mrb[6].mxu1  ;;  %1002 = vmatprep.subr.bf16.mxu0 %v854_v59  ;;  %1653 = vmatprep.subr.bf16.mxu1 %v854_v59  ;;  %v616_v59 = vpop.permute.xlu0 %615 }
 0x1f9   : > { %v757_v3 = vadd.f32 %v756_v2, %v581_v63  ;;  %v758_v4 = vpop.f32.mrb[7].mxu1  ;;  %1003 = vmatpush1.bf16.msra.mxu0 %v853_v57  ;;  %1661 = vmatpush1.bf16.msra.mxu1 %v853_v57  ;;  %v825_v6 = vmax.f32 %v753_v61, 0.0 }
 0x1fa   : > { %v759_v5 = vadd.f32 %v758_v4, %v581_v63  ;;  %v826_v8 = vmax.f32 %v755_v1, 0.0  ;;  %v621_v1 = vpop.permute.xlu1 %620 }
 0x1fb   : > { %v827_v7 = vmax.f32 %v757_v3, 0.0 }
 0x1fc   : > { %v828_v9 = vmax.f32 %v759_v5, 0.0 }
 0x1fd   : > { %v855_v10 = vpack.c.bf16 %v827_v7, %v825_v6 }
 0x1fe   : > { %v856_v12 = vpack.c.bf16 %v828_v9, %v826_v8  ;;  %v762_v13 = vpop.f32.mrb[8].mxu1 }
 0x1ff   : > { %v763_v14 = vadd.f32 %v762_v13, %v586_v11  ;;  %v764_v15 = vpop.f32.mrb[9].mxu1 }
 0x200   : > { %v765_v17 = vadd.f32 %v764_v15, %v586_v11  ;;  %v766_v18 = vpop.f32.mrb[10].mxu1  ;;  %1004 = vmatprep.subr.bf16.mxu0 %v856_v12  ;;  %1654 = vmatprep.subr.bf16.mxu1 %v856_v12  ;;  %v626_v12 = vpop.permute.xlu0 %625 }
 0x201   : > { %v767_v19 = vadd.f32 %v766_v18, %v591_v16  ;;  %v768_v20 = vpop.f32.mrb[11].mxu1  ;;  %1005 = vmatpush1.bf16.msra.mxu0 %v855_v10  ;;  %1662 = vmatpush1.bf16.msra.mxu1 %v855_v10  ;;  %v829_v22 = vmax.f32 %v763_v14, 0.0 }
 0x202   : > { %v769_v21 = vadd.f32 %v768_v20, %v591_v16  ;;  %v830_v24 = vmax.f32 %v765_v17, 0.0  ;;  %v631_v17 = vpop.permute.xlu1 %630 }
 0x203   : > { %v831_v23 = vmax.f32 %v767_v19, 0.0 }
 0x204   : > { %v832_v25 = vmax.f32 %v769_v21, 0.0 }
 0x205   : > { %v857_v26 = vpack.c.bf16 %v831_v23, %v829_v22 }
 0x206   : > { %v858_v28 = vpack.c.bf16 %v832_v25, %v830_v24  ;;  %v772_v29 = vpop.f32.mrb[12].mxu1 }
 0x207   : > { %v773_v30 = vadd.f32 %v772_v29, %v596_v27  ;;  %v774_v31 = vpop.f32.mrb[13].mxu1 }
 0x208   : > { %v775_v33 = vadd.f32 %v774_v31, %v596_v27  ;;  %v776_v34 = vpop.f32.mrb[14].mxu1  ;;  %1006 = vmatprep.subr.bf16.mxu0 %v858_v28  ;;  %1655 = vmatprep.subr.bf16.mxu1 %v858_v28  ;;  %v636_v28 = vpop.permute.xlu0 %635 }
 0x209   : > { %v777_v35 = vadd.f32 %v776_v34, %v601_v32  ;;  %v778_v36 = vpop.f32.mrb[15].mxu1  ;;  %1007 = vmatpush1.bf16.msra.mxu0 %v857_v26  ;;  %1663 = vmatpush1.bf16.msra.mxu1 %v857_v26  ;;  %v833_v38 = vmax.f32 %v773_v30, 0.0 }
 0x20a   : > { %v779_v37 = vadd.f32 %v778_v36, %v601_v32  ;;  %v834_v40 = vmax.f32 %v775_v33, 0.0  ;;  %v641_v33 = vpop.permute.xlu1 %640 }
 0x20b   : > { %v835_v39 = vmax.f32 %v777_v35, 0.0 }
 0x20c   : > { %v836_v41 = vmax.f32 %v779_v37, 0.0 }
 0x20d   : > { %v859_v42 = vpack.c.bf16 %v835_v39, %v833_v38 }
 0x20e   : > { %v860_v44 = vpack.c.bf16 %v836_v41, %v834_v40  ;;  %v782_v45 = vpop.f32.mrb[16].mxu1 }
 0x20f   : > { %v783_v46 = vadd.f32 %v782_v45, %v606_v43  ;;  %v784_v47 = vpop.f32.mrb[17].mxu1  ;;  %v1724_v45 = vld [vmem:[%s2320_s5] sm:$0xff]  }
 0x210   : > { %v785_v49 = vadd.f32 %v784_v47, %v606_v43  ;;  %v786_v50 = vpop.f32.mrb[18].mxu1  ;;  %1008 = vmatprep.subr.bf16.mxu0 %v860_v44  ;;  %1656 = vmatprep.subr.bf16.mxu1 %v860_v44  ;;  %v1726_v47 = vld [vmem:[%s2320_s5 + $0x8] sm:$0xff]  }
 0x211   : > { %v787_v51 = vadd.f32 %v786_v50, %v611_v48  ;;  %v788_v52 = vpop.f32.mrb[19].mxu1  ;;  %1009 = vmatpush1.bf16.msra.mxu0 %v859_v42  ;;  %1664 = vmatpush1.bf16.msra.mxu1 %v859_v42  ;;  %v837_v54 = vmax.f32 %v783_v46, 0.0  ;;  %v1725_v46 = vld [vmem:[%s2320_s5 + $0x60] sm:$0xff]   ;;  %v1738_v50 = vld [vmem:[%s2320_s5 + $0x70] sm:$0xff]  }
 0x212   : > { %v789_v53 = vadd.f32 %v788_v52, %v611_v48  ;;  %v838_v56 = vmax.f32 %v785_v49, 0.0  ;;  %v1727_v48 = vld [vmem:[%s2320_s5 + $0x68] sm:$0xff]   ;;  %v1728_v49 = vld [vmem:[%s2320_s5 + $0x10] sm:$0xff]   ;;  %v1739_v52 = vld [vmem:[%s2320_s5 + $0x78] sm:$0xff]  }
 0x213   : > { %v839_v55 = vmax.f32 %v787_v51, 0.0  ;;  %v1729_v51 = vld [vmem:[%s2320_s5 + $0x18] sm:$0xff]  }
 0x214   : > { %v840_v57 = vmax.f32 %v789_v53, 0.0  ;;  %v1730_v53 = vld [vmem:[%s2320_s5 + $0x20] sm:$0xff]  }
 0x215   : > { %v861_v58 = vpack.c.bf16 %v839_v55, %v837_v54  ;;  %v1731_v54 = vld [vmem:[%s2320_s5 + $0x28] sm:$0xff]   ;;  %v1732_v55 = vld [vmem:[%s2320_s5 + $0x30] sm:$0xff]  }
 0x216   : > { %v862_v60 = vpack.c.bf16 %v840_v57, %v838_v56  ;;  %v792_v61 = vpop.f32.mrb[20].mxu1  ;;  %v1733_v56 = vld [vmem:[%s2320_s5 + $0x38] sm:$0xff]   ;;  %v1734_v57 = vld [vmem:[%s2320_s5 + $0x40] sm:$0xff]  }
 0x217   : > { %v793_v62 = vadd.f32 %v792_v61, %v616_v59  ;;  %v794_v63 = vpop.f32.mrb[21].mxu1 }
 0x218   : > { %v795_v2 = vadd.f32 %v794_v63, %v616_v59  ;;  %v796_v3 = vpop.f32.mrb[22].mxu1  ;;  %1010 = vmatprep.subr.bf16.mxu0 %v862_v60  ;;  %1657 = vmatprep.subr.bf16.mxu1 %v862_v60  ;;  %v1736_v59 = vld [vmem:[%s2320_s5 + $0x50] sm:$0xff]   ;;  %v1737_v60 = vld [vmem:[%s2320_s5 + $0x58] sm:$0xff]  }
 0x219   : > { %v797_v4 = vadd.f32 %v796_v3, %v621_v1  ;;  %v798_v5 = vpop.f32.mrb[23].mxu1  ;;  %1011 = vmatpush1.bf16.msra.mxu0 %v861_v58  ;;  %1665 = vmatpush1.bf16.msra.mxu1 %v861_v58  ;;  %v841_v7 = vmax.f32 %v793_v62, 0.0  ;;  %v1735_v58 = vld [vmem:[%s2320_s5 + $0x48] sm:$0xff]  }
 0x21a   : > { %v799_v6 = vadd.f32 %v798_v5, %v621_v1  ;;  %v842_v9 = vmax.f32 %v795_v2, 0.0 }
 0x21b   : > { %v843_v8 = vmax.f32 %v797_v4, 0.0 }
 0x21c   : > { %v844_v10 = vmax.f32 %v799_v6, 0.0 }
 0x21d   : > { %v863_v11 = vpack.c.bf16 %v843_v8, %v841_v7 }
 0x21e   : > { %v864_v13 = vpack.c.bf16 %v844_v10, %v842_v9  ;;  %v802_v14 = vpop.f32.mrb[24].mxu1 }
 0x21f   : > { %v803_v15 = vadd.f32 %v802_v14, %v626_v12  ;;  %v804_v16 = vpop.f32.mrb[25].mxu1 }
 0x220   : > { %v805_v18 = vadd.f32 %v804_v16, %v626_v12  ;;  %v806_v19 = vpop.f32.mrb[26].mxu1  ;;  %1012 = vmatprep.subr.bf16.mxu0 %v864_v13  ;;  %1658 = vmatprep.subr.bf16.mxu1 %v864_v13 }
 0x221   : > { %v807_v20 = vadd.f32 %v806_v19, %v631_v17  ;;  %v808_v21 = vpop.f32.mrb[27].mxu1  ;;  %1013 = vmatpush1.bf16.msra.mxu0 %v863_v11  ;;  %1666 = vmatpush1.bf16.msra.mxu1 %v863_v11  ;;  %v845_v23 = vmax.f32 %v803_v15, 0.0 }
 0x222   : > { %v809_v22 = vadd.f32 %v808_v21, %v631_v17  ;;  %v846_v25 = vmax.f32 %v805_v18, 0.0 }
 0x223   : > { %v847_v24 = vmax.f32 %v807_v20, 0.0 }
 0x224   : > { %v848_v26 = vmax.f32 %v809_v22, 0.0 }
 0x225   : > { %v865_v27 = vpack.c.bf16 %v847_v24, %v845_v23 }
 0x226   : > { %v866_v29 = vpack.c.bf16 %v848_v26, %v846_v25  ;;  %v812_v30 = vpop.f32.mrb[28].mxu1 }
 0x227   : > { %v813_v31 = vadd.f32 %v812_v30, %v636_v28  ;;  %v814_v32 = vpop.f32.mrb[29].mxu1 }
 0x228   : > { %v815_v34 = vadd.f32 %v814_v32, %v636_v28  ;;  %v816_v35 = vpop.f32.mrb[30].mxu1  ;;  %1014 = vmatprep.subr.bf16.mxu0 %v866_v29  ;;  %1659 = vmatprep.subr.bf16.mxu1 %v866_v29 }
 0x229   : > { %v817_v36 = vadd.f32 %v816_v35, %v641_v33  ;;  %v818_v37 = vpop.f32.mrb[31].mxu1  ;;  %1015 = vmatpush1.bf16.msra.mxu0 %v865_v27  ;;  %1667 = vmatpush1.bf16.msra.mxu1 %v865_v27  ;;  %v849_v39 = vmax.f32 %v813_v31, 0.0 }
 0x22a   : > { %v819_v38 = vadd.f32 %v818_v37, %v641_v33  ;;  %v850_v41 = vmax.f32 %v815_v34, 0.0 }
 0x22b   : > { %v851_v40 = vmax.f32 %v817_v36, 0.0 }
 0x22c   : > { %v852_v42 = vmax.f32 %v819_v38, 0.0 }
 0x22d   : > { %v867_v43 = vpack.c.bf16 %v851_v40, %v849_v39 }
 0x22e   : > { %v868_v44 = vpack.c.bf16 %v852_v42, %v850_v41 }
 0x230   : > { %1016 = vmatprep.subr.bf16.mxu0 %v868_v44  ;;  %1660 = vmatprep.subr.bf16.mxu1 %v868_v44 }
 0x231   : > { %1017 = vmatpush1.bf16.msra.mxu0 %v867_v43  ;;  %1668 = vmatpush1.bf16.msra.mxu1 %v867_v43 }
 0x234   : > { %1035 = vmatmul.mubr.bf16.vlgmr.msra.gmra.mrb[16].mxu0 %v1724_v45  ;;  %1155 = vmatmul.mubr.bf16.vlgmr.msra.gmra.mrb[32].mxu1 %v1725_v46 }
 0x235   : > { %1044 = vmatprep.mubr.bf16.mxu0 %v1805_v0  ;;  %1164 = vmatprep.mubr.bf16.mxu1 %v1805_v0 }
 0x23c   : > { %1045 = vmatmul.mubr.bf16.gmra.mrb[20].mxu0 %v1726_v47  ;;  %1165 = vmatmul.mubr.bf16.gmra.mrb[36].mxu1 %v1727_v48 }
 0x23d   : > { %1054 = vmatprep.mubr.bf16.mxu0 %v1805_v0  ;;  %1174 = vmatprep.mubr.bf16.mxu1 %v1805_v0 }
 0x244   : > { %1055 = vmatmul.mubr.bf16.gmra.mrb[24].mxu0 %v1728_v49  ;;  %1175 = vmatmul.mubr.bf16.gmra.mrb[40].mxu1 %v1738_v50 }
 0x245   : > { %1064 = vmatprep.mubr.bf16.mxu0 %v1805_v0  ;;  %1184 = vmatprep.mubr.bf16.mxu1 %v1805_v0 }
 0x24c   : > { %1065 = vmatmul.mubr.bf16.gmra.mrb[28].mxu0 %v1729_v51  ;;  %1185 = vmatmul.mubr.bf16.gmra.mrb[44].mxu1 %v1739_v52 }
 0x24d   : > { %1074 = vmatprep.mubr.bf16.mxu0 %v1805_v0  ;;  %1194 = vmatprep.mubr.bf16.mxu1 %v1805_v0 }
 0x254   : > { %1075 = vmatmul.mubr.bf16.gmra.mrb[32].mxu0 %v1730_v53 }
 0x255   : > { %1084 = vmatprep.mubr.bf16.mxu0 %v1805_v0 }
 0x25c   : > { %1085 = vmatmul.mubr.bf16.gmra.mrb[36].mxu0 %v1731_v54 }
 0x25d   : > { %1094 = vmatprep.mubr.bf16.mxu0 %v1805_v0 }
 0x264   : > { %1095 = vmatmul.mubr.bf16.gmra.mrb[40].mxu0 %v1732_v55 }
 0x265   : > { %1104 = vmatprep.mubr.bf16.mxu0 %v1805_v0 }
 0x26c   : > { %1105 = vmatmul.mubr.bf16.gmra.mrb[44].mxu0 %v1733_v56 }
 0x26d   : > { %1114 = vmatprep.mubr.bf16.mxu0 %v1805_v0 }
 0x274   : > { %1115 = vmatmul.mubr.bf16.gmra.mrb[48].mxu0 %v1734_v57 }
 0x275   : > { %1124 = vmatprep.mubr.bf16.mxu0 %v1805_v0 }
 0x27c   : > { %1125 = vmatmul.mubr.bf16.gmra.mrb[52].mxu0 %v1735_v58 }
 0x27d   : > { %1134 = vmatprep.mubr.bf16.mxu0 %v1805_v0 }
 0x284   : > { %1135 = vmatmul.mubr.bf16.gmra.mrb[56].mxu0 %v1736_v59 }
 0x285   : > { %1144 = vmatprep.mubr.bf16.mxu0 %v1805_v0 }
 0x28c   : > { %1145 = vmatmul.mubr.bf16.gmra.mrb[60].mxu0 %v1737_v60 }
 0x307   : > { %v1036_v61 = vpop.f32.mrb[16].mxu0  ;;  %v1156_v62 = vpop.f32.mrb[32].mxu1 }
 0x308   : > { %v1038_v63 = vpop.f32.mrb[17].mxu0  ;;  %v1158_v1 = vpop.f32.mrb[33].mxu1 }
 0x309   : > { %v1203_v2 = vmax.f32 %v1036_v61, %v1038_v63  ;;  %v1040_v3 = vpop.f32.mrb[18].mxu0  ;;  %v1275_v4 = vmax.f32 %v1156_v62, %v1158_v1  ;;  %v1160_v5 = vpop.f32.mrb[34].mxu1 }
 0x30a   : > { %v1042_v6 = vpop.f32.mrb[19].mxu0  ;;  %v1162_v7 = vpop.f32.mrb[35].mxu1 }
 0x30b   : > { %v1206_v8 = vmax.f32 %v1040_v3, %v1042_v6  ;;  %1204 = vmax.xlane.f32.xlu0 %v1203_v2  ;;  %1276 = vmax.xlane.f32.xlu1 %v1275_v4  ;;  %v1278_v9 = vmax.f32 %v1160_v5, %v1162_v7 }
 0x30f   : > { %1207 = vmax.xlane.f32.xlu0 %v1206_v8  ;;  %v1046_v0 = vpop.f32.mrb[20].mxu0  ;;  %v1166_v10 = vpop.f32.mrb[36].mxu1 }
 0x310   : > { %v1048_v11 = vpop.f32.mrb[21].mxu0  ;;  %v1168_v12 = vpop.f32.mrb[37].mxu1 }
 0x311   : > { %v1209_v13 = vmax.f32 %v1046_v0, %v1048_v11  ;;  %v1050_v14 = vpop.f32.mrb[22].mxu0  ;;  %v1281_v15 = vmax.f32 %v1166_v10, %v1168_v12  ;;  %v1170_v16 = vpop.f32.mrb[38].mxu1 }
 0x312   : > { %v1052_v17 = vpop.f32.mrb[23].mxu0  ;;  %v1172_v18 = vpop.f32.mrb[39].mxu1 }
 0x313   : > { %v1212_v19 = vmax.f32 %v1050_v14, %v1052_v17  ;;  %1279 = vmax.xlane.f32.xlu0 %v1278_v9  ;;  %1210 = vmax.xlane.f32.xlu1 %v1209_v13  ;;  %v1284_v20 = vmax.f32 %v1170_v16, %v1172_v18 }
 0x317   : > { %1282 = vmax.xlane.f32.xlu1 %v1281_v15  ;;  %1213 = vmax.xlane.f32.xlu0 %v1212_v19  ;;  %v1056_v21 = vpop.f32.mrb[24].mxu0  ;;  %v2109_v22 = vpop.f32.mrb[40].mxu1 }
 0x318   : > { %v1058_v23 = vpop.f32.mrb[25].mxu0  ;;  %v2111_v24 = vpop.f32.mrb[41].mxu1 }
 0x319   : > { %v1215_v25 = vmax.f32 %v1056_v21, %v1058_v23  ;;  %v1060_v26 = vpop.f32.mrb[26].mxu0  ;;  %v1287_v27 = vmax.f32 %v2109_v22, %v2111_v24  ;;  %v2115_v28 = vpop.f32.mrb[42].mxu1  ;;  %v1740_v22 = vld [vmem:[%s2320_s5 + $0x80] ss:$0 sps:$4 sm:$0xff]   ;;  %v1302_v24 = vld [vmem:[%s2321_s6 + $0x8] sm:$0xff] }
 0x31a   : > { %v1062_v29 = vpop.f32.mrb[27].mxu0  ;;  %v2117_v30 = vpop.f32.mrb[43].mxu1  ;;  %1195 = vmatmul.mubr.bf16.gmra.mrb[48].mxu1 %v1740_v22  ;;  %v1312_v22 = vld [vmem:[%s2322_s7 + $0x48] sm:$0xff] }
 0x31b   : > { %v1218_v31 = vmax.f32 %v1060_v26, %v1062_v29  ;;  %1285 = vmax.xlane.f32.xlu0 %v1284_v20  ;;  %1216 = vmax.xlane.f32.xlu1 %v1215_v25  ;;  %v1290_v32 = vmax.f32 %v2115_v28, %v2117_v30 }
 0x31c   : > { %1431 = vmatprep.mubr.f32.mxu1 %v1302_v24 }
 0x31f   : > { %1219 = vmax.xlane.f32.xlu0 %v1218_v31  ;;  %v1066_v33 = vpop.f32.mrb[28].mxu0  ;;  %v2121_v34 = vpop.f32.mrb[44].mxu1 }
 0x320   : > { %v1068_v35 = vpop.f32.mrb[29].mxu0  ;;  %v2123_v36 = vpop.f32.mrb[45].mxu1 }
 0x321   : > { %v1221_v37 = vmax.f32 %v1066_v33, %v1068_v35  ;;  %v1070_v38 = vpop.f32.mrb[30].mxu0  ;;  %v1293_v39 = vmax.f32 %v2121_v34, %v2123_v36  ;;  %v2127_v40 = vpop.f32.mrb[46].mxu1 }
 0x322   : > { %v1072_v41 = vpop.f32.mrb[31].mxu0  ;;  %v2129_v42 = vpop.f32.mrb[47].mxu1 }
 0x323   : > { %v1224_v43 = vmax.f32 %v1070_v38, %v1072_v41  ;;  %1222 = vmax.xlane.f32.xlu1 %v1221_v37  ;;  %v1296_v44 = vmax.f32 %v2127_v40, %v2129_v42 }
 0x325   : > { %1225 = vmax.xlane.f32.xlu0 %v1224_v43 }
 0x327   : > { %v1076_v45 = vpop.f32.mrb[32].mxu0 }
 0x328   : > { %v1078_v46 = vpop.f32.mrb[33].mxu0 }
 0x329   : > { %v1227_v47 = vmax.f32 %v1076_v45, %v1078_v46  ;;  %v1080_v48 = vpop.f32.mrb[34].mxu0  ;;  %v1304_v46 = vld [vmem:[%s2322_s7 + $0x8] sm:$0xff] }
 0x32a   : > { %v1082_v49 = vpop.f32.mrb[35].mxu0 }
 0x32b   : > { %v1230_v50 = vmax.f32 %v1080_v48, %v1082_v49  ;;  %1228 = vmax.xlane.f32.xlu1 %v1227_v47  ;;  %v1319_v47 = vld [vmem:[%s2322_s7 + $0x80] sm:$0xff]  ;;  %v1320_v49 = vld [vmem:[%s2322_s7 + $0x88] sm:$0xff] }
 0x32d   : > { %1231 = vmax.xlane.f32.xlu0 %v1230_v50  ;;  %v1303_v50 = vld [vmem:[%s2322_s7] sm:$0xff] }
 0x32f   : > { %v1086_v51 = vpop.f32.mrb[36].mxu0 }
 0x330   : > { %v1088_v52 = vpop.f32.mrb[37].mxu0 }
 0x331   : > { %v1233_v53 = vmax.f32 %v1086_v51, %v1088_v52  ;;  %v1090_v54 = vpop.f32.mrb[38].mxu0 }
 0x332   : > { %v1092_v55 = vpop.f32.mrb[39].mxu0 }
 0x333   : > { %v1236_v56 = vmax.f32 %v1090_v54, %v1092_v55 }
 0x337   : > { %v1096_v57 = vpop.f32.mrb[40].mxu0 }
 0x338   : > { %v1098_v58 = vpop.f32.mrb[41].mxu0 }
 0x339   : > { %v1239_v59 = vmax.f32 %v1096_v57, %v1098_v58  ;;  %v1100_v60 = vpop.f32.mrb[42].mxu0  ;;  %v1306_v58 = vld [vmem:[%s2322_s7 + $0x18] sm:$0xff] }
 0x33a   : > { %v1102_v61 = vpop.f32.mrb[43].mxu0 }
 0x33b   : > { %v1242_v62 = vmax.f32 %v1100_v60, %v1102_v61  ;;  %v1322_v61 = vld [vmem:[%s2322_s7 + $0x98] sm:$0xff] }
 0x33f   : > { %v1106_v63 = vpop.f32.mrb[44].mxu0 }
 0x340   : > { %v1108_v1 = vpop.f32.mrb[45].mxu0 }
 0x341   : > { %v1245_v2 = vmax.f32 %v1106_v63, %v1108_v1  ;;  %v1110_v3 = vpop.f32.mrb[46].mxu0 }
 0x342   : > { %v1112_v4 = vpop.f32.mrb[47].mxu0 }
 0x343   : > { %v1248_v5 = vmax.f32 %v1110_v3, %v1112_v4 }
 0x347   : > { %v1116_v6 = vpop.f32.mrb[48].mxu0 }
 0x348   : > { %v1118_v7 = vpop.f32.mrb[49].mxu0 }
 0x349   : > { %v1251_v8 = vmax.f32 %v1116_v6, %v1118_v7  ;;  %v1120_v9 = vpop.f32.mrb[50].mxu0  ;;  %v1308_v7 = vld [vmem:[%s2322_s7 + $0x28] sm:$0xff] }
 0x34a   : > { %v1122_v0 = vpop.f32.mrb[51].mxu0 }
 0x34b   : > { %v1254_v10 = vmax.f32 %v1120_v9, %v1122_v0  ;;  %1252 = vmax.xlane.f32.xlu0 %v1251_v8  ;;  %v1323_v8 = vld [vmem:[%s2322_s7 + $0xa0] sm:$0xff]  ;;  %v1324_v0 = vld [vmem:[%s2322_s7 + $0xa8] sm:$0xff] }
 0x34d   : > { %1255 = vmax.xlane.f32.xlu1 %v1254_v10  ;;  %v1307_v10 = vld [vmem:[%s2322_s7 + $0x20] sm:$0xff] }
 0x34f   : > { %v1126_v11 = vpop.f32.mrb[52].mxu0 }
 0x350   : > { %v1128_v12 = vpop.f32.mrb[53].mxu0 }
 0x351   : > { %v1257_v13 = vmax.f32 %v1126_v11, %v1128_v12  ;;  %v1130_v14 = vpop.f32.mrb[54].mxu0 }
 0x352   : > { %v1132_v15 = vpop.f32.mrb[55].mxu0 }
 0x353   : > { %v1260_v16 = vmax.f32 %v1130_v14, %v1132_v15  ;;  %1258 = vmax.xlane.f32.xlu1 %v1257_v13 }
 0x355   : > { %1261 = vmax.xlane.f32.xlu0 %v1260_v16 }
 0x357   : > { %v1136_v17 = vpop.f32.mrb[56].mxu0 }
 0x358   : > { %v1138_v18 = vpop.f32.mrb[57].mxu0 }
 0x359   : > { %v1263_v19 = vmax.f32 %v1136_v17, %v1138_v18  ;;  %v1140_v20 = vpop.f32.mrb[58].mxu0  ;;  %v1327_v18 = vld [vmem:[%s2322_s7 + $0xc0] sm:$0xff] }
 0x35a   : > { %v1142_v21 = vpop.f32.mrb[59].mxu0 }
 0x35b   : > { %v1266_v23 = vmax.f32 %v1140_v20, %v1142_v21  ;;  %1264 = vmax.xlane.f32.xlu1 %v1263_v19  ;;  %v1310_v19 = vld [vmem:[%s2322_s7 + $0x38] sm:$0xff]  ;;  %v1328_v20 = vld [vmem:[%s2322_s7 + $0xc8] sm:$0xff]  ;;  %v1325_v21 = vld [vmem:[%s2322_s7 + $0xb0] sm:$0xff] }
 0x35d   : > { %1267 = vmax.xlane.f32.xlu0 %v1266_v23 }
 0x35f   : > { %v1146_v25 = vpop.f32.mrb[60].mxu0 }
 0x360   : > { %v1148_v26 = vpop.f32.mrb[61].mxu0 }
 0x361   : > { %v1269_v29 = vmax.f32 %v1146_v25, %v1148_v26  ;;  %v1150_v31 = vpop.f32.mrb[62].mxu0  ;;  %v1326_v25 = vld [vmem:[%s2322_s7 + $0xb8] sm:$0xff]  ;;  %v1309_v26 = vld [vmem:[%s2322_s7 + $0x30] sm:$0xff] }
 0x362   : > { %v1152_v33 = vpop.f32.mrb[63].mxu0 }
 0x363   : > { %v1272_v35 = vmax.f32 %v1150_v31, %v1152_v33  ;;  %1270 = vmax.xlane.f32.xlu1 %v1269_v29 }
 0x365   : > { %1273 = vmax.xlane.f32.xlu0 %v1272_v35 }
 0x367   : > { %1234 = vmax.xlane.f32.xlu1 %v1233_v53 }
 0x369   : > { %1237 = vmax.xlane.f32.xlu0 %v1236_v56 }
 0x36b   : > { %1288 = vmax.xlane.f32.xlu1 %v1287_v27  ;;  %v1446_v27 = vld [vmem:[%s2323_s8] sm:$0xff] }
 0x36d   : > { %1291 = vmax.xlane.f32.xlu0 %v1290_v32 }
 0x36f   : > { %1240 = vmax.xlane.f32.xlu1 %v1239_v59  ;;  %v1321_v59 = vld [vmem:[%s2322_s7 + $0x90] sm:$0xff] }
 0x371   : > { %1243 = vmax.xlane.f32.xlu0 %v1242_v62  ;;  %v1305_v62 = vld [vmem:[%s2322_s7 + $0x10] sm:$0xff] }
 0x373   : > { %1294 = vmax.xlane.f32.xlu1 %v1293_v39 }
 0x375   : > { %1297 = vmax.xlane.f32.xlu0 %v1296_v44 }
 0x377   : > { %1246 = vmax.xlane.f32.xlu1 %v1245_v2 }
 0x379   : > { %1249 = vmax.xlane.f32.xlu0 %v1248_v5 }
 0x38f   : > { %1449 = vperm.xlu0 %1709, %v1446_v27  }
 0x398   : > { %v1205_v28 = vpop.xlane.xlu0 %1204  ;;  %v1277_v34 = vpop.xlane.xlu1 %1276 }
 0x399   : > { %v1335_v55 = vadd.f32 %v1303_v50, %v1205_v28  ;;  %v1359_v33 = vadd.f32 %v1327_v18, %v1277_v34  ;;  %v1329_v28 = vld [vmem:[%s2322_s7 + $0xd0] sm:$0xff] }
 0x39c   : > { %v1208_v30 = vpop.xlane.xlu0 %1207 }
 0x39d   : > { %v1336_v51 = vadd.f32 %v1304_v46, %v1208_v30  ;;  %v1330_v30 = vld [vmem:[%s2322_s7 + $0xd8] sm:$0xff] }
 0x39f   : > { %v1623_v57 = vpack.c.bf16 %v1336_v51, %v1335_v55  ;;  %v1332_v51 = vld [vmem:[%s2322_s7 + $0xe8] sm:$0xff] }
 0x3a0   : > { %v2154_v32 = vpop.xlane.xlu0 %1279  ;;  %v1211_v37 = vpop.xlane.xlu1 %1210 }
 0x3a1   : > { %v1337_v4 = vadd.f32 %v1305_v62, %v1211_v37  ;;  %v1360_v35 = vadd.f32 %v1328_v20, %v2154_v32  ;;  %v1311_v32 = vld [vmem:[%s2322_s7 + $0x40] sm:$0xff] }
 0x3a3   : > { %v1637_v46 = vpack.c.bf16 %v1360_v35, %v1359_v33 }
 0x3a4   : > { %v1214_v36 = vpop.xlane.xlu0 %1213  ;;  %v2158_v39 = vpop.xlane.xlu1 %1282 }
 0x3a5   : > { %v1338_v63 = vadd.f32 %v1306_v58, %v1214_v36  ;;  %v1316_v58 = vld [vmem:[%s2322_s7 + $0x68] sm:$0xff] }
 0x3a7   : > { %v1627_v6 = vpack.c.bf16 %v1338_v63, %v1337_v4  ;;  %v1334_v4 = vld [vmem:[%s2322_s7 + $0xf8] sm:$0xff] }
 0x3a8   : > { %v2156_v38 = vpop.xlane.xlu0 %1285  ;;  %v1217_v41 = vpop.xlane.xlu1 %1216 }
 0x3a9   : > { %v1339_v15 = vadd.f32 %v1307_v10, %v1217_v41  ;;  %v1318_v10 = vld [vmem:[%s2322_s7 + $0x78] sm:$0xff] }
 0x3ac   : > { %v1220_v40 = vpop.xlane.xlu0 %1219 }
 0x3ad   : > { %v1340_v11 = vadd.f32 %v1308_v7, %v1220_v40 }
 0x3af   : > { %v1631_v17 = vpack.c.bf16 %v1340_v11, %v1339_v15 }
 0x3b0   : > { %v1223_v43 = vpop.xlane.xlu1 %1222 }
 0x3b1   : > { %v1341_v36 = vadd.f32 %v1309_v26, %v1223_v43 }
 0x3b2   : > { %v1226_v42 = vpop.xlane.xlu0 %1225 }
 0x3b3   : > { %v1342_v29 = vadd.f32 %v1310_v19, %v1226_v42 }
 0x3b5   : > { %v1635_v40 = vpack.c.bf16 %v1342_v29, %v1341_v36 }
 0x3b8   : > { %v2162_v45 = vpop.xlane.xlu1 %1228 }
 0x3b9   : > { %v1343_v43 = vadd.f32 %v1311_v32, %v2162_v45 }
 0x3ba   : > { %v2160_v44 = vpop.xlane.xlu0 %1231 }
 0x3bb   : > { %v1344_v41 = vadd.f32 %v1312_v22, %v2160_v44  ;;  %v1313_v44 = vld [vmem:[%s2322_s7 + $0x50] sm:$0xff] }
 0x3d8   : > { %v1253_v48 = vpop.xlane.xlu0 %1252 }
 0x3d9   : > { %v1351_v53 = vadd.f32 %v1319_v47, %v1253_v48  ;;  %v1361_v47 = vadd.f32 %v1329_v28, %v2158_v39  ;;  %v1362_v48 = vadd.f32 %v1330_v30, %v2156_v38  ;;  %v1639_v39 = vpack.c.bf16 %v1344_v41, %v1343_v43 }
 0x3da   : > { %v1256_v52 = vpop.xlane.xlu1 %1255 }
 0x3db   : > { %v1352_v54 = vadd.f32 %v1320_v49, %v1256_v52  ;;  %v1314_v49 = vld [vmem:[%s2322_s7 + $0x58] sm:$0xff]  ;;  %v1331_v52 = vld [vmem:[%s2322_s7 + $0xe0] sm:$0xff] }
 0x3dd   : > { %v1621_v56 = vpack.c.bf16 %v1352_v54, %v1351_v53  ;;  %v1641_v54 = vpack.c.bf16 %v1362_v48, %v1361_v47 }
 0x3df   : > { %1622 = vmatprep.subr.bf16.mxu1 %v1621_v56  ;;  %v1315_v56 = vld [vmem:[%s2322_s7 + $0x60] sm:$0xff] }
 0x3e0   : > { %1624 = vmatpush3.bf16.msra.mxu1 %v1623_v57  ;;  %v1259_v60 = vpop.xlane.xlu1 %1258 }
 0x3e1   : > { %v1353_v2 = vadd.f32 %v1321_v59, %v1259_v60 }
 0x3e2   : > { %v1262_v1 = vpop.xlane.xlu0 %1261 }
 0x3e3   : > { %v1354_v3 = vadd.f32 %v1322_v61, %v1262_v1 }
 0x3e5   : > { %v1625_v5 = vpack.c.bf16 %v1354_v3, %v1353_v2  ;;  %v1333_v2 = vld [vmem:[%s2322_s7 + $0xf0] sm:$0xff] }
 0x3e7   : > { %1626 = vmatprep.subr.bf16.mxu1 %v1625_v5 }
 0x3e8   : > { %1628 = vmatpush3.bf16.msra.mxu1 %v1627_v6  ;;  %v1265_v9 = vpop.xlane.xlu1 %1264 }
 0x3e9   : > { %v1355_v13 = vadd.f32 %v1323_v8, %v1265_v9  ;;  %v1317_v9 = vld [vmem:[%s2322_s7 + $0x70] sm:$0xff] }
 0x3ea   : > { %v1268_v12 = vpop.xlane.xlu0 %1267 }
 0x3eb   : > { %v1356_v14 = vadd.f32 %v1324_v0, %v1268_v12 }
 0x3ed   : > { %v1629_v16 = vpack.c.bf16 %v1356_v14, %v1355_v13 }
 0x3ef   : > { %1630 = vmatprep.subr.bf16.mxu1 %v1629_v16  ;;  %v1301_v16 = vld [vmem:[%s2321_s6] sm:$0xff] }
 0x3f0   : > { %1632 = vmatpush3.bf16.msra.mxu1 %v1631_v17  ;;  %v1271_v23 = vpop.xlane.xlu1 %1270  ;;  %v1196_v17 = vpop.f32.mrb[48].mxu1 }
 0x3f1   : > { %v1357_v24 = vadd.f32 %v1325_v21, %v1271_v23  ;;  %v1198_v18 = vpop.f32.mrb[49].mxu1 }
 0x3f2   : > { %v1274_v31 = vpop.xlane.xlu0 %1273  ;;  %v1200_v19 = vpop.f32.mrb[50].mxu1 }
 0x3f3   : > { %v1358_v27 = vadd.f32 %v1326_v25, %v1274_v31  ;;  %v1201_v20 = vpop.f32.mrb[51].mxu1 }
 0x3f4   : > { %v1235_v37 = vpop.xlane.xlu1 %1234 }
 0x3f5   : > { %v1633_v34 = vpack.c.bf16 %v1358_v27, %v1357_v24  ;;  %v1345_v55 = vadd.f32 %v1313_v44, %v1235_v37 }
 0x3f6   : > { %v1238_v42 = vpop.xlane.xlu0 %1237 }
 0x3f7   : > { %1634 = vmatprep.subr.bf16.mxu1 %v1633_v34  ;;  %v1346_v38 = vadd.f32 %v1314_v49, %v1238_v42 }
 0x3f8   : > { %v1289_v50 = vpop.xlane.xlu1 %1288  ;;  %1636 = vmatpush3.bf16.msra.mxu1 %v1635_v40 }
 0x3f9   : > { %1638 = vmatprep.subr.bf16.mxu1 %v1637_v46  ;;  %v1363_v59 = vadd.f32 %v1331_v52, %v1289_v50  ;;  %v1643_v60 = vpack.c.bf16 %v1346_v38, %v1345_v55 }
 0x3fa   : > { %v1292_v53 = vpop.xlane.xlu0 %1291 }
 0x3fb   : > { %v1364_v45 = vadd.f32 %v1332_v51, %v1292_v53 }
 0x3fc   : > { %v1241_v57 = vpop.xlane.xlu1 %1240  ;;  %1640 = vmatpush3.bf16.msra.mxu1 %v1639_v39 }
 0x3fd   : > { %1642 = vmatprep.subr.bf16.mxu1 %v1641_v54  ;;  %v1645_v62 = vpack.c.bf16 %v1364_v45, %v1363_v59  ;;  %v1347_v63 = vadd.f32 %v1315_v56, %v1241_v57 }
 0x3fe   : > { %v1244_v61 = vpop.xlane.xlu0 %1243 }
 0x3ff   : > { %v1348_v1 = vadd.f32 %v1316_v58, %v1244_v61 }
 0x400   : > { %v1295_v3 = vpop.xlane.xlu1 %1294  ;;  %1644 = vmatpush3.bf16.msra.mxu1 %v1643_v60 }
 0x401   : > { %v1647_v5 = vpack.c.bf16 %v1348_v1, %v1347_v63  ;;  %1646 = vmatprep.subr.bf16.mxu1 %v1645_v62  ;;  %v1365_v7 = vadd.f32 %v1333_v2, %v1295_v3 }
 0x402   : > { %v1298_v6 = vpop.xlane.xlu0 %1297 }
 0x403   : > { %v1366_v8 = vadd.f32 %v1334_v4, %v1298_v6 }
 0x404   : > { %v1247_v0 = vpop.xlane.xlu1 %1246  ;;  %1648 = vmatpush3.bf16.msra.mxu1 %v1647_v5 }
 0x405   : > { %v1649_v11 = vpack.c.bf16 %v1366_v8, %v1365_v7  ;;  %v1349_v13 = vadd.f32 %v1317_v9, %v1247_v0 }
 0x406   : > { %v1250_v12 = vpop.xlane.xlu0 %1249 }
 0x407   : > { %v1350_v14 = vadd.f32 %v1318_v10, %v1250_v12  ;;  %1650 = vmatprep.subr.bf16.mxu1 %v1649_v11 }
 0x409   : > { %v1651_v15 = vpack.c.bf16 %v1350_v14, %v1349_v13 }
 0x40b   : > { %1652 = vmatpush3.bf16.msra.mxu1 %v1651_v15 }
 0x40e   : > { %1432 = vmatmul.mubr.f32.vlgmr.msra.gmra.mrb[52].mxu1 %v1301_v16  ;;  %v1450_v33 = vpop.permute.xlu0 %1449 }
 0x4e1   : > { %v1618_v21 = vpop.f32.mrb[52].mxu1 }
 0x4e2   : > { %v1619_v23 = vpop.f32.mrb[53].mxu1 }
 0x4e3   : > { %v1620_v25 = vadd.f32 %v1619_v23, %v1618_v21 }
 0x4e5   : > { %1441 = vperm.xlu1 %1710, %v1620_v25  }
 0x564   : > { %v1442_v26 = vpop.permute.xlu1 %1441 }
 0x565   : > { %v1444_v29 = vadd.f32 %v1442_v26, %v1196_v17  ;;  %v1445_v31 = vadd.f32 %v1442_v26, %v1198_v18 }
 0x567   : > { %v1452_v35 = vadd.f32 %v1450_v33, %v1444_v29  ;;  %v1453_v22 = vadd.f32 %v1450_v33, %v1445_v31 }
 0x569   : > { %1454 = vst [vmem:[%s325_s25] sm:$0xff] %v1452_v35  ;;  %1455 = vst [vmem:[%s325_s25 + $0x8] sm:$0xff] %v1453_v22 }
 0x56a   : > { %1754 = shalt.err (!%p1751_p3)
}
 0x56b   : > { %s1755_s23 = scalar_lea.hbm %s2273_s29, 256  ;;  %s1759_s25 = scalar_lea.hbm %s2324_s9, 512 }
 0x56c   : > { %p1756_p4 = scmp.ne.s32.totalorder %s2273_s29, %s1755_s23  ;;  %p1760_p9 = scmp.lt.u32.totalorder %s2273_s29, %s2324_s9 }
 0x56d   : > { %p1761_p10 = scmp.lt.u32.totalorder %s1759_s25, %s1755_s23  ;;  %p1763_p12 = scmp.lt.u32.totalorder %s1755_s23, %s2273_s29 }
 0x56e   : > { %p1757_p7 = pnand %p1756_p4, %p1895_p5 }
 0x56f   : > { %p1762_p11 = por %p1761_p10, %p1760_p9 }
 0x570   : > { %p1758_p8 = pneg %p1757_p7 }
 0x571   : > { %p1764_p13 = por %p1763_p12, %p1762_p11 }
 0x573   : > { %p1765_p0 = pnand %p1764_p13, %p1758_p8 }
 0x575   : > { %1768 = shalt.err (!%p1765_p0)
}
 0x576   : > { %1669 = dma.vmem_to_hbm [thread:$0]  (%p1895_p5), %s2275_s26, 256, %s2273_s29, %s1457_s13  }
 0x577 PF: > { %p1675_p1 = scmp.ge.s32.totalorder %s1803_s12, 2  ;;  %s1483_s14 = sand.u32 1, %s1791_s30  }
 0x578   : > { %s1484_s16 = scalar_lea.sflag [#allocation4], %s1483_s14 }
 0x579   : > { %p1672_p2 = pnand %p1675_p1, %p1899_p6 }
 0x57b   : > { %1786 = dma.done.wait (!%p1672_p2), %s1484_s16, 256  }
 0x57c   : > { %1788 = vsyncadd (!%p1672_p2), %s1484_s16, 4294967040  ;;  %p19_p3 = scmp.ge.s32.totalorder %s1882_s15, 4   ;;  %s2327_s30 = smov %s1795_s10 }
 0x57d   : > { %s2328_s10 = smov %s1799_s11  ;;  %s2329_s11 = smov %s1893_s18 }
 0x57e   : > { %s2330_s12 = smov %s1882_s15  ;;  %21 = sbr.rel (!%p19_p3) target bundleno = 3 (0x3), region = 91 }
 0x585   :  { %1489 = vsyncpa [#allocation4], 1 }
 0x586   :  { %1491 = vsyncpa [#allocation4 + $0x1], 1 }

</bundles_post_ra>
